<compile_context>
chip_gen: v7x
topology: tpu7x:2x2x1
jax: 0.10.0
libtpu: 0.0.40
codegen_flags: <defaults>
</compile_context>

<pallas_src>
import functools
import math

import jax
import jax.numpy as jnp
from jax import lax
from jax.experimental import pallas as pl
from jax.experimental.pallas import tpu as pltpu

TPAD = 8  # lanes reserved for the scalar t input in the fused bottom matmul


# ----------------------------------------------------------------------------
# Pallas kernel: entire MeanSampler forward for one batch tile.
# ----------------------------------------------------------------------------
def mean_sampler_kernel(
    xin_ref,   # (TB, ndim+TPAD)     bf16   [t | 0-pad | x]
    wb_ref,    # (ndim+TPAD, 2*ndim) bf16   fused block-diag bottom weight
    bb_ref,    # (1, 2*ndim)         f32    [b1 | b2]
    wj_ref,    # (2*ndim, ndim)      bf16   join weight (transposed, [t rows; x rows])
    bj_ref,    # (1, ndim)           f32
    rw1_ref,   # (L, ndim, ndim)     bf16   resblock first-linear weights (transposed)
    rb1_ref,   # (L, 1, ndim)        f32
    rw2_ref,   # (L, ndim, ndim)     bf16   resblock second-linear weights (transposed)
    rb2_ref,   # (L, 1, ndim)        f32
    wh_ref,    # (ndim, ndim)        bf16   head weight (transposed)
    bh_ref,    # (1, ndim)           f32
    out_ref,   # (TB, ndim)          f32
    *,
    num_layers: int,
):
    f32, bf16 = jnp.float32, jnp.bfloat16

    # Fused bottom1/bottom2: one MXU dot yields cat([bottom1(t), bottom2(x)], -1).
    cat_h = jnp.maximum(
        jnp.dot(xin_ref[...], wb_ref[...], preferred_element_type=f32) + bb_ref[...],
        0.0,
    )

    # join: single K=2*ndim contraction; cat_h is already the concatenated input.
    h = jnp.maximum(
        jnp.dot(cat_h.astype(bf16), wj_ref[...], preferred_element_type=f32)
        + bj_ref[...],
        0.0,
    )

    # ResLinear: x = relu( Linear(relu(Linear(x))) + x ), num_layers times.
    def res_layer(h, w_a, b_a, w_b, b_b):
        res = h
        y = jnp.maximum(
            jnp.dot(h.astype(bf16), w_a, preferred_element_type=f32) + b_a, 0.0
        )
        y = jnp.dot(y.astype(bf16), w_b, preferred_element_type=f32) + b_b
        return jnp.maximum(y + res, 0.0)

    if num_layers <= 4:
        # Small, static L: fully unrolled for LLO scheduler visibility.
        for l in range(num_layers):
            h = res_layer(h, rw1_ref[l], rb1_ref[l], rw2_ref[l], rb2_ref[l])
    else:
        # Larger L: bound live ranges / code size with a real loop.
        h = lax.fori_loop(
            0,
            num_layers,
            lambda l, h: res_layer(h, rw1_ref[l], rb1_ref[l], rw2_ref[l], rb2_ref[l]),
            h,
            unroll=2,
        )

    # mean = head(x)
    out_ref[...] = (
        jnp.dot(h.astype(bf16), wh_ref[...], preferred_element_type=f32) + bh_ref[...]
    ).astype(out_ref.dtype)


# ----------------------------------------------------------------------------
# Wrapper: batch grid over rows; weights VMEM-resident across grid steps.
# ----------------------------------------------------------------------------
def mean_sampler_forward(x, t, params, *, num_layers, batch_tile=None,
                         core_parallel=False):
    """x: (B, ndim), t: (B, 1) -> mean: (B, ndim) f32."""
    B, ndim = x.shape

    if batch_tile is None:
        batch_tile = min(512, B)
        if B >= 512:
            batch_tile = min(batch_tile, B // 2)  # >=2 grid steps (v7x dual-TC)
    # TODO(synk): ragged batches (B % batch_tile != 0) need pl.cdiv + a masked
    # final tile or wrapper-side padding.
    assert B % batch_tile == 0, "batch must be divisible by batch_tile"
    assert batch_tile % 8 == 0, "batch_tile must be a multiple of 8 (prefer 16 for bf16 packing)"
    grid = (B // batch_tile,)

    # Fused bf16 activation stream: [t | 0-pad(TPAD-1) | x], built once.
    xin = jnp.concatenate(
        [t.astype(jnp.float32),
         jnp.zeros((B, TPAD - 1), jnp.float32),
         x.astype(jnp.float32)],
        axis=-1,
    ).astype(jnp.bfloat16)

    weights = (
        params["wb"], params["bb"],
        params["wj"], params["bj"],
        params["rw1"], params["rb1"], params["rw2"], params["rb2"],
        params["wh"], params["bh"],
    )

    def const_spec(arr):
        # Whole-array block whose index never changes -> VMEM-resident, DMA'd once.
        n = arr.ndim
        return pl.BlockSpec(arr.shape, lambda b, _n=n: (0,) * _n)

    in_specs = [pl.BlockSpec((batch_tile, ndim + TPAD), lambda b: (b, 0))]
    in_specs += [const_spec(w) for w in weights]

    # Explicit VMEM budget: double-buffered blocks + headroom.
    def _nbytes(a):
        return a.size * a.dtype.itemsize

    block_bytes = (
        batch_tile * (ndim + TPAD) * 2      # xin block (bf16)
        + batch_tile * ndim * 4             # out block (f32)
        + sum(_nbytes(w) for w in weights)  # resident weights
    )
    vmem_limit = int(max(16 << 20, 2 * block_bytes + (4 << 20)))

    semantics = (pltpu.CORE_PARALLEL if core_parallel else "parallel",)

    kernel = functools.partial(mean_sampler_kernel, num_layers=num_layers)
    return pl.pallas_call(
        kernel,
        grid=grid,
        out_shape=jax.ShapeDtypeStruct((B, ndim), jnp.float32),
        in_specs=in_specs,
        out_specs=pl.BlockSpec((batch_tile, ndim), lambda b: (b, 0)),
        compiler_params=pltpu.CompilerParams(
            dimension_semantics=semantics,
            vmem_limit_bytes=vmem_limit,
        ),
    )(xin, *weights)


# ----------------------------------------------------------------------------
# Deterministic synthetic parameter init (nn.Linear fan-in init; no checkpoints).
# Raw params are f32, transposed to (in_features, out_features).
# ----------------------------------------------------------------------------
def init_params(key, ndim, num_layers):
    def linear(key, fan_in, fan_out):
        kw, kb = jax.random.split(key)
        bound = 1.0 / math.sqrt(fan_in)
        w = jax.random.uniform(kw, (fan_in, fan_out), jnp.float32, -bound, bound)
        b = jax.random.uniform(kb, (1, fan_out), jnp.float32, -bound, bound)
        return w, b

    keys = jax.random.split(key, 4 + 2 * num_layers)
    w1, b1 = linear(keys[0], 1, ndim)            # bottom1: Linear(1, ndim)
    w2, b2 = linear(keys[1], ndim, ndim)         # bottom2: Linear(ndim, ndim)
    wj, bj = linear(keys[2], 2 * ndim, ndim)     # join:    Linear(2*ndim, ndim), rows [t; x]
    wh, bh = linear(keys[3], ndim, ndim)         # head:    Linear(ndim, ndim)

    rw1, rb1, rw2, rb2 = [], [], [], []
    for l in range(num_layers):
        a_w, a_b = linear(keys[4 + 2 * l], ndim, ndim)
        c_w, c_b = linear(keys[5 + 2 * l], ndim, ndim)
        rw1.append(a_w); rb1.append(a_b); rw2.append(c_w); rb2.append(c_b)

    return {
        "w1": w1, "b1": b1, "w2": w2, "b2": b2,
        "wj": wj, "bj": bj,
        "rw1": jnp.stack(rw1), "rb1": jnp.stack(rb1),
        "rw2": jnp.stack(rw2), "rb2": jnp.stack(rb2),
        "wh": wh, "bh": bh,
    }


def pack_params(raw, ndim):
    """Build kernel params: fused block-diag bottom weight + bf16 matmul weights."""
    bf16 = jnp.bfloat16
    wb = jnp.zeros((ndim + TPAD, 2 * ndim), jnp.float32)
    wb = wb.at[0, :ndim].set(raw["w1"][0])        # t -> bottom1 columns
    wb = wb.at[TPAD:, ndim:].set(raw["w2"])       # x -> bottom2 columns
    bb = jnp.concatenate([raw["b1"], raw["b2"]], axis=-1)
    return {
        "wb": wb.astype(bf16), "bb": bb,
        "wj": raw["wj"].astype(bf16), "bj": raw["bj"],
        "rw1": raw["rw1"].astype(bf16), "rb1": raw["rb1"],
        "rw2": raw["rw2"].astype(bf16), "rb2": raw["rb2"],
        "wh": raw["wh"].astype(bf16), "bh": raw["bh"],
    }


# ----------------------------------------------------------------------------
# Pure-JAX reference (unfused structure, identical numerics: bf16 matmul inputs,
# f32 accumulation, f32 elementwise) — validates the block-diag fusion too.
# ----------------------------------------------------------------------------
def mean_sampler_reference(x, t, raw, *, num_layers):
    bf16, f32 = jnp.bfloat16, jnp.float32
    dot = lambda a, w: jnp.dot(a.astype(bf16), w.astype(bf16),
                               preferred_element_type=f32)
    relu = lambda v: jnp.maximum(v, 0.0)

    t_h = relu(dot(t, raw["w1"]) + raw["b1"])
    x_h = relu(dot(x, raw["w2"]) + raw["b2"])
    h = relu(dot(jnp.concatenate([t_h, x_h], -1), raw["wj"]) + raw["bj"])
    for l in range(num_layers):
        res = h
        y = relu(dot(h, raw["rw1"][l]) + raw["rb1"][l])
        y = dot(y, raw["rw2"][l]) + raw["rb2"][l]
        h = relu(y + res)
    return dot(h, raw["wh"]) + raw["bh"]


if __name__ == "__main__":
    # TB=32 (multiple of 16 for bf16 sublane packing), grid=(2,) exercises
    # weight residency across grid steps and megacore sharding.
    B, NDIM, NUM_LAYERS, BATCH_TILE = 64, 128, 2, 32

    key = jax.random.PRNGKey(0)
    k_params, k_x, k_t = jax.random.split(key, 3)

    raw = init_params(k_params, NDIM, NUM_LAYERS)
    params = pack_params(raw, NDIM)
    x = jax.random.normal(k_x, (B, NDIM), jnp.float32)
    t = jax.random.normal(k_t, (B, 1), jnp.float32)

    out = mean_sampler_forward(x, t, params, num_layers=NUM_LAYERS,
                               batch_tile=BATCH_TILE)
    out = jax.block_until_ready(out)

    ref = mean_sampler_reference(x, t, raw, num_layers=NUM_LAYERS)
    assert out.shape == (B, NDIM)
    assert jnp.allclose(out, ref, atol=2e-2, rtol=2e-2), "mismatch vs reference"

    print("KERNEL_OK")
</pallas_src>

<mosaic_0001>
module attributes {stable_mosaic.version = 11 : i64} {
  func.func @mean_sampler_kernel(%arg0: i32, %arg1: memref<32x136xbf16, #tpu.memory_space<vmem>>, %arg2: memref<136x256xbf16, #tpu.memory_space<vmem>>, %arg3: memref<1x256xf32, #tpu.memory_space<vmem>>, %arg4: memref<256x128xbf16, #tpu.memory_space<vmem>>, %arg5: memref<1x128xf32, #tpu.memory_space<vmem>>, %arg6: memref<2x128x128xbf16, #tpu.memory_space<vmem>>, %arg7: memref<2x1x128xf32, #tpu.memory_space<vmem>>, %arg8: memref<2x128x128xbf16, #tpu.memory_space<vmem>>, %arg9: memref<2x1x128xf32, #tpu.memory_space<vmem>>, %arg10: memref<128x128xbf16, #tpu.memory_space<vmem>>, %arg11: memref<1x128xf32, #tpu.memory_space<vmem>>, %arg12: memref<32x128xf32, #tpu.memory_space<vmem>>) attributes {dimension_semantics = [#tpu.dimension_semantics<parallel>], iteration_bounds = array<i64: 2>, scalar_prefetch = 0 : i64, scratch_operands = 0 : i64, tpu.core_type = #tpu.core_type<tc>, window_params = [{transform_indices = @transform_0, window_bounds = array<i64: 32, 136>}, {pipeline_mode = #tpu.pipeline_mode<synchronous>, transform_indices = @transform_1, window_bounds = array<i64: 136, 256>}, {pipeline_mode = #tpu.pipeline_mode<synchronous>, transform_indices = @transform_2, window_bounds = array<i64: 1, 256>}, {pipeline_mode = #tpu.pipeline_mode<synchronous>, transform_indices = @transform_3, window_bounds = array<i64: 256, 128>}, {pipeline_mode = #tpu.pipeline_mode<synchronous>, transform_indices = @transform_4, window_bounds = array<i64: 1, 128>}, {pipeline_mode = #tpu.pipeline_mode<synchronous>, transform_indices = @transform_5, window_bounds = array<i64: 2, 128, 128>}, {pipeline_mode = #tpu.pipeline_mode<synchronous>, transform_indices = @transform_6, window_bounds = array<i64: 2, 1, 128>}, {pipeline_mode = #tpu.pipeline_mode<synchronous>, transform_indices = @transform_7, window_bounds = array<i64: 2, 128, 128>}, {pipeline_mode = #tpu.pipeline_mode<synchronous>, transform_indices = @transform_8, window_bounds = array<i64: 2, 1, 128>}, {pipeline_mode = #tpu.pipeline_mode<synchronous>, transform_indices = @transform_9, window_bounds = array<i64: 128, 128>}, {pipeline_mode = #tpu.pipeline_mode<synchronous>, transform_indices = @transform_10, window_bounds = array<i64: 1, 128>}, {transform_indices = @transform_11, window_bounds = array<i64: 32, 128>}]} {
    %c0 = arith.constant 0 : index
    %c0_0 = arith.constant 0 : index
    %0 = vector.load %arg1[%c0, %c0_0] : memref<32x136xbf16, #tpu.memory_space<vmem>>, vector<32x136xbf16>
    %c0_1 = arith.constant 0 : index
    %c0_2 = arith.constant 0 : index
    %1 = vector.load %arg2[%c0_1, %c0_2] : memref<136x256xbf16, #tpu.memory_space<vmem>>, vector<136x256xbf16>
    %cst = arith.constant dense<0.000000e+00> : vector<32x256xf32>
    %2 = tpu.matmul %0, %1, %cst {dimension_numbers = #tpu.dot_dimension_numbers<[1], [0], [0], [1], [0, 0, 1, 1], [], []>} : vector<32x136xbf16>, vector<136x256xbf16>, vector<32x256xf32> -> vector<32x256xf32>
    %c0_3 = arith.constant 0 : index
    %c0_4 = arith.constant 0 : index
    %3 = vector.load %arg3[%c0_3, %c0_4] : memref<1x256xf32, #tpu.memory_space<vmem>>, vector<1x256xf32>
    %4 = vector.broadcast %3 : vector<1x256xf32> to vector<32x256xf32>
    %5 = arith.addf %2, %4 : vector<32x256xf32>
    %cst_5 = arith.constant 0.000000e+00 : f32
    %6 = vector.broadcast %cst_5 : f32 to vector<32x256xf32>
    %7 = arith.maximumf %5, %6 : vector<32x256xf32>
    %8 = arith.truncf %7 : vector<32x256xf32> to vector<32x256xbf16>
    %c0_6 = arith.constant 0 : index
    %c0_7 = arith.constant 0 : index
    %9 = vector.load %arg4[%c0_6, %c0_7] : memref<256x128xbf16, #tpu.memory_space<vmem>>, vector<256x128xbf16>
    %cst_8 = arith.constant dense<0.000000e+00> : vector<32x128xf32>
    %10 = tpu.matmul %8, %9, %cst_8 {dimension_numbers = #tpu.dot_dimension_numbers<[1], [0], [0], [1], [0, 0, 1, 1], [], []>} : vector<32x256xbf16>, vector<256x128xbf16>, vector<32x128xf32> -> vector<32x128xf32>
    %c0_9 = arith.constant 0 : index
    %c0_10 = arith.constant 0 : index
    %11 = vector.load %arg5[%c0_9, %c0_10] : memref<1x128xf32, #tpu.memory_space<vmem>>, vector<1x128xf32>
    %12 = vector.broadcast %11 : vector<1x128xf32> to vector<32x128xf32>
    %13 = arith.addf %10, %12 : vector<32x128xf32>
    %cst_11 = arith.constant 0.000000e+00 : f32
    %14 = vector.broadcast %cst_11 : f32 to vector<32x128xf32>
    %15 = arith.maximumf %13, %14 : vector<32x128xf32>
    %c0_12 = arith.constant 0 : index
    %c0_13 = arith.constant 0 : index
    %c0_14 = arith.constant 0 : index
    %16 = vector.load %arg6[%c0_12, %c0_13, %c0_14] : memref<2x128x128xbf16, #tpu.memory_space<vmem>>, vector<1x128x128xbf16>
    %17 = vector.shape_cast %16 : vector<1x128x128xbf16> to vector<128x128xbf16>
    %c0_15 = arith.constant 0 : index
    %c0_16 = arith.constant 0 : index
    %c0_17 = arith.constant 0 : index
    %18 = vector.load %arg7[%c0_15, %c0_16, %c0_17] : memref<2x1x128xf32, #tpu.memory_space<vmem>>, vector<1x1x128xf32>
    %19 = vector.shape_cast %18 : vector<1x1x128xf32> to vector<1x128xf32>
    %c0_18 = arith.constant 0 : index
    %c0_19 = arith.constant 0 : index
    %c0_20 = arith.constant 0 : index
    %20 = vector.load %arg8[%c0_18, %c0_19, %c0_20] : memref<2x128x128xbf16, #tpu.memory_space<vmem>>, vector<1x128x128xbf16>
    %21 = vector.shape_cast %20 : vector<1x128x128xbf16> to vector<128x128xbf16>
    %c0_21 = arith.constant 0 : index
    %c0_22 = arith.constant 0 : index
    %c0_23 = arith.constant 0 : index
    %22 = vector.load %arg9[%c0_21, %c0_22, %c0_23] : memref<2x1x128xf32, #tpu.memory_space<vmem>>, vector<1x1x128xf32>
    %23 = vector.shape_cast %22 : vector<1x1x128xf32> to vector<1x128xf32>
    %24 = arith.truncf %15 : vector<32x128xf32> to vector<32x128xbf16>
    %cst_24 = arith.constant dense<0.000000e+00> : vector<32x128xf32>
    %25 = tpu.matmul %24, %17, %cst_24 {dimension_numbers = #tpu.dot_dimension_numbers<[1], [0], [0], [1], [0, 0, 1, 1], [], []>} : vector<32x128xbf16>, vector<128x128xbf16>, vector<32x128xf32> -> vector<32x128xf32>
    %26 = vector.broadcast %19 : vector<1x128xf32> to vector<32x128xf32>
    %27 = arith.addf %25, %26 : vector<32x128xf32>
    %cst_25 = arith.constant 0.000000e+00 : f32
    %28 = vector.broadcast %cst_25 : f32 to vector<32x128xf32>
    %29 = arith.maximumf %27, %28 : vector<32x128xf32>
    %30 = arith.truncf %29 : vector<32x128xf32> to vector<32x128xbf16>
    %cst_26 = arith.constant dense<0.000000e+00> : vector<32x128xf32>
    %31 = tpu.matmul %30, %21, %cst_26 {dimension_numbers = #tpu.dot_dimension_numbers<[1], [0], [0], [1], [0, 0, 1, 1], [], []>} : vector<32x128xbf16>, vector<128x128xbf16>, vector<32x128xf32> -> vector<32x128xf32>
    %32 = vector.broadcast %23 : vector<1x128xf32> to vector<32x128xf32>
    %33 = arith.addf %31, %32 : vector<32x128xf32>
    %34 = arith.addf %33, %15 : vector<32x128xf32>
    %cst_27 = arith.constant 0.000000e+00 : f32
    %35 = vector.broadcast %cst_27 : f32 to vector<32x128xf32>
    %36 = arith.maximumf %34, %35 : vector<32x128xf32>
    %c1 = arith.constant 1 : index
    %c0_28 = arith.constant 0 : index
    %c0_29 = arith.constant 0 : index
    %37 = vector.load %arg6[%c1, %c0_28, %c0_29] : memref<2x128x128xbf16, #tpu.memory_space<vmem>>, vector<1x128x128xbf16>
    %38 = vector.shape_cast %37 : vector<1x128x128xbf16> to vector<128x128xbf16>
    %c1_30 = arith.constant 1 : index
    %c0_31 = arith.constant 0 : index
    %c0_32 = arith.constant 0 : index
    %39 = vector.load %arg7[%c1_30, %c0_31, %c0_32] : memref<2x1x128xf32, #tpu.memory_space<vmem>>, vector<1x1x128xf32>
    %40 = vector.shape_cast %39 : vector<1x1x128xf32> to vector<1x128xf32>
    %c1_33 = arith.constant 1 : index
    %c0_34 = arith.constant 0 : index
    %c0_35 = arith.constant 0 : index
    %41 = vector.load %arg8[%c1_33, %c0_34, %c0_35] : memref<2x128x128xbf16, #tpu.memory_space<vmem>>, vector<1x128x128xbf16>
    %42 = vector.shape_cast %41 : vector<1x128x128xbf16> to vector<128x128xbf16>
    %c1_36 = arith.constant 1 : index
    %c0_37 = arith.constant 0 : index
    %c0_38 = arith.constant 0 : index
    %43 = vector.load %arg9[%c1_36, %c0_37, %c0_38] : memref<2x1x128xf32, #tpu.memory_space<vmem>>, vector<1x1x128xf32>
    %44 = vector.shape_cast %43 : vector<1x1x128xf32> to vector<1x128xf32>
    %45 = arith.truncf %36 : vector<32x128xf32> to vector<32x128xbf16>
    %cst_39 = arith.constant dense<0.000000e+00> : vector<32x128xf32>
    %46 = tpu.matmul %45, %38, %cst_39 {dimension_numbers = #tpu.dot_dimension_numbers<[1], [0], [0], [1], [0, 0, 1, 1], [], []>} : vector<32x128xbf16>, vector<128x128xbf16>, vector<32x128xf32> -> vector<32x128xf32>
    %47 = vector.broadcast %40 : vector<1x128xf32> to vector<32x128xf32>
    %48 = arith.addf %46, %47 : vector<32x128xf32>
    %cst_40 = arith.constant 0.000000e+00 : f32
    %49 = vector.broadcast %cst_40 : f32 to vector<32x128xf32>
    %50 = arith.maximumf %48, %49 : vector<32x128xf32>
    %51 = arith.truncf %50 : vector<32x128xf32> to vector<32x128xbf16>
    %cst_41 = arith.constant dense<0.000000e+00> : vector<32x128xf32>
    %52 = tpu.matmul %51, %42, %cst_41 {dimension_numbers = #tpu.dot_dimension_numbers<[1], [0], [0], [1], [0, 0, 1, 1], [], []>} : vector<32x128xbf16>, vector<128x128xbf16>, vector<32x128xf32> -> vector<32x128xf32>
    %53 = vector.broadcast %44 : vector<1x128xf32> to vector<32x128xf32>
    %54 = arith.addf %52, %53 : vector<32x128xf32>
    %55 = arith.addf %54, %36 : vector<32x128xf32>
    %cst_42 = arith.constant 0.000000e+00 : f32
    %56 = vector.broadcast %cst_42 : f32 to vector<32x128xf32>
    %57 = arith.maximumf %55, %56 : vector<32x128xf32>
    %58 = arith.truncf %57 : vector<32x128xf32> to vector<32x128xbf16>
    %c0_43 = arith.constant 0 : index
    %c0_44 = arith.constant 0 : index
    %59 = vector.load %arg10[%c0_43, %c0_44] : memref<128x128xbf16, #tpu.memory_space<vmem>>, vector<128x128xbf16>
    %cst_45 = arith.constant dense<0.000000e+00> : vector<32x128xf32>
    %60 = tpu.matmul %58, %59, %cst_45 {dimension_numbers = #tpu.dot_dimension_numbers<[1], [0], [0], [1], [0, 0, 1, 1], [], []>} : vector<32x128xbf16>, vector<128x128xbf16>, vector<32x128xf32> -> vector<32x128xf32>
    %c0_46 = arith.constant 0 : index
    %c0_47 = arith.constant 0 : index
    %61 = vector.load %arg11[%c0_46, %c0_47] : memref<1x128xf32, #tpu.memory_space<vmem>>, vector<1x128xf32>
    %62 = vector.broadcast %61 : vector<1x128xf32> to vector<32x128xf32>
    %63 = arith.addf %60, %62 : vector<32x128xf32>
    %c0_48 = arith.constant 0 : index
    %c0_49 = arith.constant 0 : index
    %64 = vector.load %arg12[%c0_48, %c0_49] : memref<32x128xf32, #tpu.memory_space<vmem>>, vector<32x128xf32>
    tpu.vector_store %arg12[%c0_48, %c0_49], %63 {strides = array<i32>} : memref<32x128xf32, #tpu.memory_space<vmem>>, vector<32x128xf32>,
    return
  }
  func.func @transform_0(%arg0: i32) -> (i32, i32) {
    %c0_i32 = arith.constant 0 : i32
    %c0_i32_0 = arith.constant 0 : i32
    return %arg0, %c0_i32 : i32, i32
  }
  func.func @transform_1(%arg0: i32) -> (i32, i32) {
    %c0_i32 = arith.constant 0 : i32
    %c0_i32_0 = arith.constant 0 : i32
    %c0_i32_1 = arith.constant 0 : i32
    return %c0_i32, %c0_i32_0 : i32, i32
  }
  func.func @transform_2(%arg0: i32) -> (i32, i32) {
    %c0_i32 = arith.constant 0 : i32
    %c0_i32_0 = arith.constant 0 : i32
    %c0_i32_1 = arith.constant 0 : i32
    return %c0_i32, %c0_i32_0 : i32, i32
  }
  func.func @transform_3(%arg0: i32) -> (i32, i32) {
    %c0_i32 = arith.constant 0 : i32
    %c0_i32_0 = arith.constant 0 : i32
    %c0_i32_1 = arith.constant 0 : i32
    return %c0_i32, %c0_i32_0 : i32, i32
  }
  func.func @transform_4(%arg0: i32) -> (i32, i32) {
    %c0_i32 = arith.constant 0 : i32
    %c0_i32_0 = arith.constant 0 : i32
    %c0_i32_1 = arith.constant 0 : i32
    return %c0_i32, %c0_i32_0 : i32, i32
  }
  func.func @transform_5(%arg0: i32) -> (i32, i32, i32) {
    %c0_i32 = arith.constant 0 : i32
    %c0_i32_0 = arith.constant 0 : i32
    %c0_i32_1 = arith.constant 0 : i32
    %c0_i32_2 = arith.constant 0 : i32
    return %c0_i32, %c0_i32_0, %c0_i32_1 : i32, i32, i32
  }
  func.func @transform_6(%arg0: i32) -> (i32, i32, i32) {
    %c0_i32 = arith.constant 0 : i32
    %c0_i32_0 = arith.constant 0 : i32
    %c0_i32_1 = arith.constant 0 : i32
    %c0_i32_2 = arith.constant 0 : i32
    return %c0_i32, %c0_i32_0, %c0_i32_1 : i32, i32, i32
  }
  func.func @transform_7(%arg0: i32) -> (i32, i32, i32) {
    %c0_i32 = arith.constant 0 : i32
    %c0_i32_0 = arith.constant 0 : i32
    %c0_i32_1 = arith.constant 0 : i32
    %c0_i32_2 = arith.constant 0 : i32
    return %c0_i32, %c0_i32_0, %c0_i32_1 : i32, i32, i32
  }
  func.func @transform_8(%arg0: i32) -> (i32, i32, i32) {
    %c0_i32 = arith.constant 0 : i32
    %c0_i32_0 = arith.constant 0 : i32
    %c0_i32_1 = arith.constant 0 : i32
    %c0_i32_2 = arith.constant 0 : i32
    return %c0_i32, %c0_i32_0, %c0_i32_1 : i32, i32, i32
  }
  func.func @transform_9(%arg0: i32) -> (i32, i32) {
    %c0_i32 = arith.constant 0 : i32
    %c0_i32_0 = arith.constant 0 : i32
    %c0_i32_1 = arith.constant 0 : i32
    return %c0_i32, %c0_i32_0 : i32, i32
  }
  func.func @transform_10(%arg0: i32) -> (i32, i32) {
    %c0_i32 = arith.constant 0 : i32
    %c0_i32_0 = arith.constant 0 : i32
    %c0_i32_1 = arith.constant 0 : i32
    return %c0_i32, %c0_i32_0 : i32, i32
  }
  func.func @transform_11(%arg0: i32) -> (i32, i32) {
    %c0_i32 = arith.constant 0 : i32
    %c0_i32_0 = arith.constant 0 : i32
    return %arg0, %c0_i32 : i32, i32
  }
}

</mosaic_0001>

<bundles_post_ra>
// kernel: tpu_custom_call.1
= control target key start
LH: loop header
LB: loop body
LE: loop exit
PB: predicated region body
PF: predicated region fallthrough
CT: control target
= control target key end

     0   :  { %s2873_s0 = inlined_call_operand.hbm [shape: bf16[64,136], index: 0, kind: input, shape index: {}]   ;;  %s2874_s1 = inlined_call_operand.hbm [shape: bf16[136,256], index: 1, kind: input, shape index: {}]   ;;  %s2875_s2 = inlined_call_operand.vmem [shape: f32[1,256], index: 2, kind: input, shape index: {}]   ;;  %s2876_s3 = inlined_call_operand.hbm [shape: bf16[256,128], index: 3, kind: input, shape index: {}]   ;;  %s2877_s4 = inlined_call_operand.vmem [shape: f32[1,128], index: 4, kind: input, shape index: {}]   ;;  %s2878_s5 = inlined_call_operand.hbm [shape: bf16[2,128,128], index: 5, kind: input, shape index: {}]   ;;  %s2879_s6 = inlined_call_operand.vmem [shape: f32[2,1,128], index: 6, kind: input, shape index: {}]   ;;  %s2880_s7 = inlined_call_operand.hbm [shape: bf16[2,128,128], index: 7, kind: input, shape index: {}]   ;;  %s2881_s8 = inlined_call_operand.vmem [shape: f32[2,1,128], index: 8, kind: input, shape index: {}]   ;;  %s2882_s9 = inlined_call_operand.hbm [shape: bf16[128,128], index: 9, kind: input, shape index: {}]   ;;  %s2883_s10 = inlined_call_operand.vmem [shape: f32[1,128], index: 10, kind: input, shape index: {}]   ;;  %s2884_s11 = inlined_call_operand.hbm [shape: f32[64,128], index: 11, kind: output, shape index: {}]  }
   0x1   :  { %2892 = sst [smem:[#allocation19_spill]] %s2874_s1 }
   0x2   :  { %2893 = sst [smem:[#allocation20_spill]] %s2881_s8 }
   0x3   :  { %2894 = sst [smem:[#allocation21_spill]] %s2883_s10 }
   0x4   :  { %2895 = sst [smem:[#allocation22_spill]] %s2884_s11 }
   0x5   :  { %16 = vsyncpa [#allocation3], 0 }
   0x6   :  { %18 = vsyncpa [#allocation3 + $0x1], 0 }
   0x7   :  { %19 = vsyncpa [#allocation6], 0 }
   0x8   :  { %20 = vsyncpa [#allocation9], 0 }
   0x9   :  { %21 = vsyncpa [#allocation12], 0 }
   0xa   :  { %22 = vsyncpa [#allocation4], 0 }
   0xb   :  { %24 = vsyncpa [#allocation4 + $0x1], 0  ;;  %s2471_s17 = smov 0   ;;  %s2473_s18 = smov 0  }
   0xc   :  { %s2475_s19 = smov 0   ;;  %s2477_s20 = smov 0  }
   0xd LB: > { %s2398_s21 = smov [#allocation5]   ;;  %s2492_s23 = sadd.s32 4294967295, %s2396_s20   ;;  %s2396_s20 = sphi %s2477_s20, %s2923_s20   ;;  %s2392_s19 = sphi %s2475_s19, %s2922_s19   ;;  %s2388_s18 = sphi %s2473_s18, %s2921_s18   ;;  %s2384_s17 = sphi %s2471_s17, %s2920_s17  }
   0xe   : > { %s309_s22 = sshll.u32 %s2398_s21, 4  ;;  %p1663_p0 = scmp.ge.s32.totalorder %s2396_s20, 1  ;;  %s2497_s22 = int_to_ptr.vmem [resolvable:$true] %s309_s22 }
   0xf   : > { %p2888_p1 = scmp.eq.s32.totalorder %s2492_s23, 0  ;;  %p297_p2 = scmp.lt.s32.totalorder %s2396_s20, 3 }
  0x10   : > { %s2399_s26 = smov [#allocation8]   ;;  %s2400_s28 = smov [#allocation7]  }
  0x11   : > { %p2499_p3 = pnand %p1663_p0, %p297_p2  ;;  %s341_s27 = sshll.u32 %s2399_s26, 4  ;;  %s2512_s27 = int_to_ptr.vmem [resolvable:$true] %s341_s27 }
  0x12   : > { %s2514_s29 = sshll.u32 %s2400_s28, 4  ;;  %s2898_s1 = sld [smem:[#allocation19_spill]]  ;;  %s326_s29 = int_to_ptr.vmem [resolvable:$true] %s2514_s29 }
  0x13   : > { %s2896_s24 = scalar_select %p2499_p3, 1, 0 }
  0x14   : > { %p1981_p5 = pneg %p2499_p3 }
  0x16   : > { %p2508_p6 = pnand %p1981_p5, %p2888_p1 }
  0x18   : > { %s2148_s13 = scalar_lea.hbm %s2898_s1, 2176  ;;  %p2524_p8 = pneg %p2508_p6 }
  0x19   : > { %p2149_p7 = scmp.ne.s32.totalorder %s2898_s1, %s2148_s13  ;;  %p2155_p11 = scmp.lt.u32.totalorder %s2148_s13, %s2898_s1 }
  0x1b   : > { %p2151_p9 = pnand %p2524_p8, %p2149_p7 }
  0x1d   : > { %p2152_p10 = pneg %p2151_p9 }
  0x1f   : > { %p2157_p12 = pnand %p2155_p11, %p2152_p10 }
  0x21   : > { %2160 = shalt.err (!%p2157_p12)
}
  0x22   : > { %s2161_s28 = scalar_lea.vmem %s2497_s22, 2176  ;;  %p2169_p5 = scmp.lt.s32.totalorder %s2497_s22, %s2497_s22 }
  0x23   : > { %p2162_p13 = scmp.ne.s32.totalorder %s2497_s22, %s2161_s28  ;;  %p2170_p4 = scmp.lt.s32.totalorder %s2161_s28, %s2161_s28 }
  0x25   : > { %p2164_p0 = pnand %p2162_p13, %p2524_p8  ;;  %p2171_p7 = por %p2170_p4, %p2169_p5 }
  0x27   : > { %p2165_p2 = pneg %p2164_p0 }
  0x29   : > { %p2172_p9 = pnand %p2171_p7, %p2165_p2 }
  0x2b   : > { %2175 = shalt.err (!%p2172_p9)
}
  0x2c   : > { %s2887_s30 = smov 128   ;;  %s2890_s12 = smov 8  }
  0x2d   : > { %1984 = dma.hbm_to_vmem [thread:$0]  (!%p2508_p6), %s2898_s1, 2176, %s2497_s22, [#allocation6], %s2887_s30, %s2887_s30, %s2890_s12  }
  0x2e   : > { %s2176_s26 = scalar_lea.hbm %s2878_s5, 2048 }
  0x2f   : > { %p2177_p4 = scmp.ne.s32.totalorder %s2878_s5, %s2176_s26  ;;  %p2183_p12 = scmp.lt.u32.totalorder %s2176_s26, %s2878_s5 }
  0x31   : > { %p2179_p10 = pnand %p2177_p4, %p2524_p8 }
  0x33   : > { %p2180_p11 = pneg %p2179_p10 }
  0x35   : > { %p2185_p13 = pnand %p2183_p12, %p2180_p11 }
  0x37   : > { %2188 = shalt.err (!%p2185_p13)
}
  0x38   : > { %s2189_s22 = scalar_lea.vmem %s2512_s27, 2048  ;;  %p2197_p7 = scmp.lt.s32.totalorder %s2512_s27, %s2512_s27 }
  0x39   : > { %p2190_p0 = scmp.ne.s32.totalorder %s2512_s27, %s2189_s22  ;;  %p2198_p9 = scmp.lt.s32.totalorder %s2189_s22, %s2189_s22 }
  0x3b   : > { %p2192_p2 = pnand %p2190_p0, %p2524_p8  ;;  %p2199_p4 = por %p2198_p9, %p2197_p7 }
  0x3d   : > { %p2193_p5 = pneg %p2192_p2 }
  0x3f   : > { %p2200_p10 = pnand %p2199_p4, %p2193_p5 }
  0x41   : > { %2203 = shalt.err (!%p2200_p10)
}
  0x42   : > { %s2403_s11 = smov 64   ;;  %s2404_s8 = smov 4  }
  0x43   : > { %1990 = dma.hbm_to_vmem [thread:$0]  (!%p2508_p6), %s2878_s5, 2048, %s2512_s27, [#allocation9], %s2403_s11, %s2403_s11, %s2404_s8  }
  0x44   : > { %s2204_s21 = scalar_lea.hbm %s2876_s3, 2048 }
  0x45   : > { %p2205_p11 = scmp.ne.s32.totalorder %s2876_s3, %s2204_s21  ;;  %p2211_p0 = scmp.lt.u32.totalorder %s2204_s21, %s2876_s3 }
  0x47   : > { %p2207_p12 = pnand %p2205_p11, %p2524_p8 }
  0x49   : > { %p2208_p13 = pneg %p2207_p12 }
  0x4b   : > { %p2213_p2 = pnand %p2211_p0, %p2208_p13 }
  0x4d   : > { %2216 = shalt.err (!%p2213_p2)
}
  0x4e   : > { %s2217_s10 = scalar_lea.vmem %s326_s29, 2048  ;;  %p2225_p4 = scmp.lt.s32.totalorder %s326_s29, %s326_s29 }
  0x4f   : > { %p2218_p5 = scmp.ne.s32.totalorder %s326_s29, %s2217_s10  ;;  %p2226_p10 = scmp.lt.s32.totalorder %s2217_s10, %s2217_s10 }
  0x51   : > { %p2220_p7 = pnand %p2218_p5, %p2524_p8  ;;  %p2227_p1 = por %p2226_p10, %p2225_p4 }
  0x53   : > { %p2221_p9 = pneg %p2220_p7 }
  0x55   : > { %p2228_p3 = pnand %p2227_p1, %p2221_p9 }
  0x57   : > { %2231 = shalt.err (!%p2228_p3)
}
  0x58   : > { %1987 = dma.hbm_to_vmem [thread:$0]  (!%p2508_p6), %s2876_s3, 2048, %s326_s29, [#allocation6], %s2403_s11, %s2403_s11, %s2404_s8  }
  0x59   : > { %s2405_s13 = smov [#allocation10]   ;;  %s2406_s15 = smov [#allocation11]  }
  0x5a   : > { %s357_s14 = sshll.u32 %s2405_s13, 4  ;;  %s373_s21 = sshll.u32 %s2406_s15, 4  ;;  %s358_s14 = int_to_ptr.vmem [resolvable:$true] %s357_s14  ;;  %s374_s21 = int_to_ptr.vmem [resolvable:$true] %s373_s21 }
  0x5b   : > { %s2232_s22 = scalar_lea.hbm %s2880_s7, 2048 }
  0x5c   : > { %p2233_p1 = scmp.ne.s32.totalorder %s2880_s7, %s2232_s22  ;;  %p2239_p12 = scmp.lt.u32.totalorder %s2232_s22, %s2880_s7 }
  0x5e   : > { %p2235_p3 = pnand %p2233_p1, %p2524_p8 }
  0x60   : > { %p2236_p11 = pneg %p2235_p3 }
  0x62   : > { %p2241_p13 = pnand %p2239_p12, %p2236_p11 }
  0x64   : > { %2244 = shalt.err (!%p2241_p13)
}
  0x65   : > { %s2245_s29 = scalar_lea.vmem %s358_s14, 2048  ;;  %p2253_p7 = scmp.lt.s32.totalorder %s358_s14, %s358_s14 }
  0x66   : > { %p2246_p0 = scmp.ne.s32.totalorder %s358_s14, %s2245_s29  ;;  %p2254_p9 = scmp.lt.s32.totalorder %s2245_s29, %s2245_s29 }
  0x68   : > { %p2248_p2 = pnand %p2246_p0, %p2524_p8  ;;  %p2255_p4 = por %p2254_p9, %p2253_p7 }
  0x6a   : > { %p2249_p5 = pneg %p2248_p2 }
  0x6c   : > { %p2256_p10 = pnand %p2255_p4, %p2249_p5 }
  0x6e   : > { %2259 = shalt.err (!%p2256_p10)
}
  0x6f   : > { %1993 = dma.hbm_to_vmem [thread:$0]  (!%p2508_p6), %s2880_s7, 2048, %s358_s14, [#allocation9], %s2403_s11, %s2403_s11, %s2404_s8  }
  0x70   : > { %s2260_s15 = scalar_lea.hbm %s2882_s9, 1024 }
  0x71   : > { %p2261_p1 = scmp.ne.s32.totalorder %s2882_s9, %s2260_s15  ;;  %p2267_p12 = scmp.lt.u32.totalorder %s2260_s15, %s2882_s9 }
  0x73   : > { %p2263_p3 = pnand %p2261_p1, %p2524_p8 }
  0x75   : > { %p2264_p11 = pneg %p2263_p3 }
  0x77   : > { %p2269_p13 = pnand %p2267_p12, %p2264_p11 }
  0x79   : > { %2272 = shalt.err (!%p2269_p13)
}
  0x7a   : > { %s2273_s27 = scalar_lea.vmem %s374_s21, 1024  ;;  %p2281_p7 = scmp.lt.s32.totalorder %s374_s21, %s374_s21 }
  0x7b   : > { %p2274_p0 = scmp.ne.s32.totalorder %s374_s21, %s2273_s27  ;;  %p2282_p9 = scmp.lt.s32.totalorder %s2273_s27, %s2273_s27 }
  0x7d   : > { %p2276_p2 = pnand %p2274_p0, %p2524_p8  ;;  %p2283_p4 = por %p2282_p9, %p2281_p7 }
  0x7f   : > { %p2277_p5 = pneg %p2276_p2 }
  0x81   : > { %p2284_p10 = pnand %p2283_p4, %p2277_p5 }
  0x83   : > { %2287 = shalt.err (!%p2284_p10)
}
  0x84   : > { %1996 = dma.hbm_to_vmem [thread:$0]  (!%p2508_p6), %s2882_s9, 1024, %s374_s21, [#allocation12], %s2403_s11, %s2403_s11, %s2404_s8  }
  0x85   : > { %s1662_s25 = sadd.s32 4294967294, %s2396_s20   ;;  %s2640_s16 = sadd.s32 1, %s2396_s20  }
  0x86   : > { %s37_s1 = sadd.s32 1, %s2392_s19  ;;  %s34_s12 = ssub.s32 %s2396_s20, %s2640_s16 }
  0x87   : > { %p44_p8 = scmp.ne.s32.totalorder %s2392_s19, %s2388_s18  ;;  %p35_p1 = scmp.eq.s32.totalorder %s34_s12, 0 }
  0x88   : > { %p45_p3 = scmp.eq.s32.totalorder %s2396_s20, 0  ;;  %p50_p11 = scmp.ne.s32.totalorder %s2388_s18, %s2384_s17 }
  0x89   : > { %p284_p12 = scmp.eq.s32.totalorder %s2492_s23, 1  ;;  %p2900_p0 = scmp.eq.s32.totalorder %s2492_s23, 0 }
  0x8a   : > { %s2652_s30 = scalar_select %p35_p1, %s2392_s19, %s37_s1  }
  0x8b   : > { %p46_p13 = por %p45_p3, %p44_p8  ;;  %p2656_p2 = por %p2900_p0, %p50_p11 }
  0x8c   : > { %p2660_p6 = por %p284_p12, %p44_p8  ;;  %p290_p5 = scmp.eq.s32.totalorder %s1662_s25, 1 }
  0x8d   : > { %p2010_p7 = scmp.lt.s32.totalorder %s2396_s20, 2  ;;  %s390_s8 = sand.u32 1, %s2392_s19  }
  0x8e   : > { %s2902_s11 = scalar_select %p2660_p6, 1, 0 }
  0x8f   : > { %p2666_p9 = por %p290_p5, %p50_p11  ;;  %s1670_s15 = sshll.u32 %s390_s8, 5 }
  0x90   : > { %s1777_s26 = sshll.u32 %s2396_s20, 9  ;;  %s394_s27 = scalar_lea.vmem [#allocation2], %s1670_s15 }
  0x91   : > { %s2903_s21 = scalar_select %p2666_p9, 1, 0 }
  0x92   : > { %s2674_s10 = scalar_lea.hbm %s2873_s0, %s1777_s26  ;;  %s402_s14 = sshll.u32 %s394_s27, 4  ;;  %s2680_s14 = int_to_ptr.vmem [resolvable:$true] %s402_s14 }
  0x93   : > { %p2676_p4 = pnand %p2010_p7, %p46_p13  ;;  %s2682_s25 = scalar_lea.sflag [#allocation3], %s390_s8 }
  0x94   : > { %s2288_s1 = scalar_lea.hbm %s2674_s10, 512  ;;  %s2293_s26 = scalar_lea.hbm %s2873_s0, 1024 }
  0x95   : > { %p2289_p10 = scmp.ne.s32.totalorder %s2674_s10, %s2288_s1  ;;  %p2290_p8 = pneg %p2676_p4 }
  0x96   : > { %p2294_p11 = scmp.lt.u32.totalorder %s2674_s10, %s2873_s0  ;;  %p2295_p12 = scmp.lt.u32.totalorder %s2293_s26, %s2288_s1 }
  0x97   : > { %p2291_p1 = pnand %p2290_p8, %p2289_p10  ;;  %p2297_p0 = scmp.lt.u32.totalorder %s2288_s1, %s2674_s10 }
  0x98   : > { %p2296_p13 = por %p2295_p12, %p2294_p11 }
  0x99   : > { %p2292_p3 = pneg %p2291_p1 }
  0x9a   : > { %p2298_p5 = por %p2297_p0, %p2296_p13 }
  0x9c   : > { %p2299_p7 = pnand %p2298_p5, %p2292_p3 }
  0x9e   : > { %2302 = shalt.err (!%p2299_p7)
}
  0x9f   : > { %s2303_s8 = scalar_lea.vmem %s2680_s14, 512  ;;  %s2407_s27 = smov [#allocation2]  }
  0xa0   : > { %p2304_p10 = scmp.ne.s32.totalorder %s2680_s14, %s2303_s8  ;;  %s2308_s12 = sshll.u32 %s2407_s27, 4  ;;  %s2309_s12 = int_to_ptr.vmem [resolvable:$false] %s2308_s12 }
  0xa1   : > { %s2310_s15 = scalar_lea.vmem %s2309_s12, 1024  ;;  %p2311_p6 = scmp.lt.s32.totalorder %s2680_s14, %s2309_s12 }
  0xa2   : > { %p2306_p1 = pnand %p2304_p10, %p2290_p8  ;;  %p2312_p11 = scmp.lt.s32.totalorder %s2310_s15, %s2303_s8 }
  0xa4   : > { %p2307_p9 = pneg %p2306_p1  ;;  %p2313_p12 = por %p2312_p11, %p2311_p6 }
  0xa6   : > { %p2314_p13 = pnand %p2313_p12, %p2307_p9 }
  0xa8   : > { %2317 = shalt.err (!%p2314_p13)
}
  0xa9   : > { %s2905_s1 = smov 8   ;;  %s2906_s26 = smov 128  }
  0xaa   : > { %2000 = dma.hbm_to_vmem [thread:$0]  (!%p2676_p4), %s2674_s10, 512, %s2680_s14, %s2682_s25, %s2906_s26, %s2906_s26, %s2905_s1  }
  0xab   : > { %p2907_p8 = scmp.ne.s32.totalorder %s2896_s24, 0 }
  0xac   : > { %s2716_s28 = sand.u32 (!%p2907_p8), 1, %s2388_s18  }
  0xad   : > { %414 = sbr.rel (%p2907_p8) target bundleno = 1805 (0x70d), region = 64  ;;  %s1675_s22 = sshll.u32 (!%p2907_p8), %s2716_s28, 5 }
  0xae   : > { %s417_s8 = scalar_lea.sflag (!%p2907_p8), [#allocation3], %s2716_s28  ;;  %s2722_s29 = scalar_lea.vmem (!%p2907_p8), [#allocation2], %s1675_s22 }
  0xb4   : > { %2363 = dma.done.wait (%p2656_p2), %s417_s8, 512  }
  0xb5   : > { %2365 = vsyncadd (%p2656_p2), %s417_s8, 4294966784  ;;  %p2908_p6 = scmp.eq.s32.totalorder %s2492_s23, 0 }
  0xb7   : > { %2367 = dma.done.wait (%p2908_p6), [#allocation6], 4224   ;;  %p2909_p9 = pmov %p2908_p6 }
  0xb8   : > { %p2910_p4 = pmov %p2908_p6 }
  0xb9   : > { %2369 = vsyncadd (%p2909_p9), [#allocation6], 4294963072 }
  0xba   : > { %2371 = dma.done.wait (%p2910_p4), [#allocation9], 4096   ;;  %p2911_p3 = pmov %p2910_p4 }
  0xbc   : > { %2373 = vsyncadd (%p2911_p3), [#allocation9], 4294963200  ;;  %p2912_p0 = pmov %p2911_p3 }
  0xbe   : > { %2375 = dma.done.wait (%p2912_p0), [#allocation12], 1024   ;;  %p2913_p5 = pmov %p2912_p0 }
  0xbf   : > { %v2060_v0 = vld [vmem:[#allocation5 + $0x4] ss:$8 sps:$4 sm:$0xff]   ;;  %v2062_v1 = vld [vmem:[#allocation5] ss:$8 sps:$4 sm:$0xff]   ;;  %v2063_v2 = vld [vmem:[#allocation5 + $0x14] ss:$8 sps:$4 sm:$0xff]   ;;  %v505_v41 = vlaneseq }
  0xc0   : > { %2377 = vsyncadd (%p2913_p5), [#allocation12], 4294966272  ;;  %632 = vmatprep.subr.bf16.mxu0 %v2060_v0  ;;  %v2065_v3 = vld [vmem:[#allocation5 + $0x10] ss:$8 sps:$4 sm:$0xff]   ;;  %v2066_v4 = vld [vmem:[#allocation5 + $0x24] ss:$8 sps:$4 sm:$0xff]  }
  0xc1   : > { %633 = vmatpush1.bf16.msra.mxu0 %v2062_v1  ;;  %v2068_v5 = vld [vmem:[#allocation5 + $0x20] ss:$8 sps:$4 sm:$0xff]   ;;  %v2069_v6 = vld [vmem:[#allocation5 + $0x34] ss:$8 sps:$4 sm:$0xff]   ;;  %v2071_v7 = vld [vmem:[#allocation5 + $0x30] ss:$8 sps:$4 sm:$0xff]  }
  0xc2   : > { %634 = vmatprep.subr.bf16.mxu0 %v2063_v2  ;;  %v2072_v8 = vld [vmem:[#allocation5 + $0x44] ss:$8 sps:$4 sm:$0xff]   ;;  %vm618_vm0 = vcmask 64512   ;;  %v2074_v10 = vld [vmem:[#allocation5 + $0x40] ss:$8 sps:$4 sm:$0xff]   ;;  %v2094_v15 = vld [vmem:[#allocation7 + $0x48] sm:$0xff]  }
  0xc3   : > { %v2088_v9 = vld [vmem:[%s2722_s29 + $0x4] ss:$8 sps:$4 sm:$0xff]   ;;  %v2075_v12 = vld [vmem:[#allocation5 + $0x54] ss:$8 sps:$4 sm:$0xff]   ;;  %v2077_v18 = vld [vmem:[#allocation5 + $0x50] ss:$8 sps:$4 sm:$0xff]  }
  0xc4   : > { %v2092_v11 = vld [vmem:[#allocation7 + $0x40] sm:$0xff]   ;;  %1705 = vmatprep.mubr.msk.bf16.mxu0 %vm618_vm0, %v2088_v9  ;;  %v502_v13 = vld [vmem:[#allocation5 + $0x80] sm:$0xff]  ;;  %v2095_v16 = vld [vmem:[#allocation7 + $0x8] sm:$0xff]   ;;  %vm625_vm1 = vcmask 1043456   ;;  %v506_v42 = vshrl.u32 %v505_v41, 7  ;;  %s2914_s1 = sld [smem:[#allocation20_spill]] }
  0xc5   : > { %635 = vmatpush1.bf16.msra.mxu0 %v2065_v3  ;;  %1779 = vmatprep.subr.bf16.mxu1 %v2092_v11  ;;  %v2093_v14 = vld [vmem:[#allocation7] sm:$0xff]   ;;  %v2096_v17 = vld [vmem:[#allocation7 + $0x50] sm:$0xff]   ;;  %v1702_v20 = vcombine.low %v502_v13, %v502_v13  ;;  %v2098_v23 = vld [vmem:[#allocation7 + $0x58] sm:$0xff]   ;;  %v1703_v30 = vcombine.high %v502_v13, %v502_v13  ;;  %s2915_s14 = sld [smem:[#allocation21_spill]]  ;;  %s478_s25 = scalar_lea.vmem [#allocation13], %s1675_s22 }
  0xc6   : > { %636 = vmatprep.subr.bf16.mxu0 %v2066_v4  ;;  %1780 = vmatpush3.bf16.msra.mxu1 %v2093_v14  ;;  %v2078_v19 = vld [vmem:[#allocation5 + $0x64] ss:$8 sps:$4 sm:$0xff]   ;;  %v2080_v21 = vld [vmem:[#allocation5 + $0x60] ss:$8 sps:$4 sm:$0xff]   ;;  %v2097_v22 = vld [vmem:[#allocation7 + $0x10] sm:$0xff]   ;;  %v507_v43 = vsub.s32 0, %v506_v42 }
  0xc7   : > { %1781 = vmatprep.subr.bf16.mxu1 %v2094_v15  ;;  %v2081_v24 = vld [vmem:[#allocation5 + $0x74] ss:$8 sps:$4 sm:$0xff]   ;;  %v627_v25 = vsel %vm625_vm1, %v1702_v20, 0  ;;  %v2099_v26 = vld [vmem:[#allocation7 + $0x18] sm:$0xff]   ;;  %v2100_v27 = vld [vmem:[#allocation7 + $0x60] sm:$0xff]   ;;  %v511_v45 = vsub.s32 1, %v506_v42 }
  0xc8   : > { %v2083_v28 = vld [vmem:[#allocation5 + $0x70] ss:$8 sps:$4 sm:$0xff]   ;;  %v2101_v29 = vld [vmem:[#allocation7 + $0x20] sm:$0xff]   ;;  %v2089_v33 = vld [vmem:[%s2722_s29 + $0x14] ss:$8 sps:$4 sm:$0xff]   ;;  %s1541_s27 = sshll.u32 %s478_s25, 4  ;;  %s2824_s27 = int_to_ptr.vmem [resolvable:$true] %s1541_s27 }
  0xc9   : > { %637 = vmatpush1.bf16.msra.mxu0 %v2068_v5  ;;  %v2102_v31 = vld [vmem:[#allocation7 + $0x68] sm:$0xff]   ;;  %v2086_v32 = vld [vmem:[%s2722_s29] ss:$8 sps:$4 sm:$0xff]   ;;  %v2104_v36 = vld [vmem:[#allocation7 + $0x70] sm:$0xff]   ;;  %s1778_s12 = sshll.u32 %s2492_s23, 9  ;;  %s2916_s22 = sld [smem:[#allocation22_spill]] }
  0xca   : > { %638 = vmatprep.subr.bf16.mxu0 %v2069_v6  ;;  %1782 = vmatpush3.bf16.msra.mxu1 %v2095_v16  ;;  %v2091_v34 = vld [vmem:[%s2722_s29 + $0x10] ss:$8 sps:$4 sm:$0xff]   ;;  %v2106_v38 = vld [vmem:[#allocation7 + $0x78] sm:$0xff]   ;;  %v2108_v40 = vld [vmem:[#allocation8] sm:$0xff]   ;;  %s1528_s23 = scalar_lea.sflag [#allocation4], %s2716_s28  ;;  %s2318_s29 = scalar_lea.vmem %s2824_s27, 512 }
  0xcb   : > { %1783 = vmatprep.subr.bf16.mxu1 %v2096_v17  ;;  %v2103_v35 = vld [vmem:[#allocation7 + $0x28] sm:$0xff]   ;;  %v2105_v37 = vld [vmem:[#allocation7 + $0x30] sm:$0xff]   ;;  %v2107_v39 = vld [vmem:[#allocation7 + $0x38] sm:$0xff]   ;;  %p2319_p2 = scmp.ne.s32.totalorder %s2824_s27, %s2318_s29  ;;  %p2917_p7 = scmp.ne.s32.totalorder %s2902_s11, 0 }
  0xcc   : > { %v503_v44 = vld [vmem:[%s2875_s2] sm:$0x3]  ;;  %v2109_v1 = vld [vmem:[#allocation8 + $0x8] sm:$0xff]   ;;  %v2110_v9 = vld [vmem:[#allocation8 + $0x10] sm:$0xff]   ;;  %s2408_s24 = smov [#allocation13]  }
  0xcd   : > { %639 = vmatpush1.bf16.msra.mxu0 %v2071_v7  ;;  %v508_v46 = vrot.slane %v503_v44, %v507_v43  ;;  %v512_v47 = vrot.slane %v503_v44, %v511_v45  ;;  %v2111_v14 = vld [vmem:[#allocation8 + $0x18] sm:$0xff]   ;;  %v2112_v15 = vld [vmem:[#allocation8 + $0x20] sm:$0xff]   ;;  %v2113_v16 = vld [vmem:[#allocation8 + $0x28] sm:$0xff]   ;;  %p2320_p10 = pnand %p2319_p2, %p2917_p7  ;;  %s2322_s13 = sshll.u32 %s2408_s24, 4  ;;  %s2323_s13 = int_to_ptr.vmem [resolvable:$false] %s2322_s13 }
  0xce   : > { %640 = vmatprep.subr.bf16.mxu0 %v2072_v8  ;;  %1784 = vmatpush3.bf16.msra.mxu1 %v2097_v22  ;;  %v2114_v17 = vld [vmem:[#allocation8 + $0x30] sm:$0xff]   ;;  %v2117_v20 = vld [vmem:[#allocation10 + $0x8] sm:$0xff]   ;;  %v2119_v22 = vld [vmem:[#allocation10 + $0x18] sm:$0xff]   ;;  %s2324_s10 = scalar_lea.vmem %s2323_s13, 1024  ;;  %p2325_p11 = scmp.lt.s32.totalorder %s2824_s27, %s2323_s13 }
  0xcf   : > { %1785 = vmatprep.subr.bf16.mxu1 %v2098_v23  ;;  %v2120_v23 = vld [vmem:[#allocation10 + $0x20] sm:$0xff]   ;;  %s2829_s8 = scalar_lea.hbm %s2916_s22, %s1778_s12  ;;  %p2321_p1 = pneg %p2320_p10 }
  0xd0   : > { %p2326_p12 = scmp.lt.s32.totalorder %s2324_s10, %s2318_s29 }
  0xd1   : > { %641 = vmatpush1.bf16.msra.mxu0 %v2074_v10 }
  0xd2   : > { %642 = vmatprep.subr.bf16.mxu0 %v2075_v12  ;;  %1786 = vmatpush3.bf16.msra.mxu1 %v2099_v26  ;;  %v1707_v26 = vld [vmem:[%s2877_s4] ss:$0 sm:$0xff]  ;;  %p2327_p13 = por %p2326_p12, %p2325_p11 }
  0xd3   : > { %1787 = vmatprep.subr.bf16.mxu1 %v2100_v27 }
  0xd4   : > { %p2328_p8 = pnand %p2327_p13, %p2321_p1 }
  0xd5   : > { %643 = vmatpush1.bf16.msra.mxu0 %v2077_v18  ;;  %v2115_v18 = vld [vmem:[#allocation8 + $0x38] sm:$0xff]  }
  0xd6   : > { %644 = vmatprep.subr.bf16.mxu0 %v2078_v19  ;;  %1788 = vmatpush3.bf16.msra.mxu1 %v2101_v29  ;;  %v2116_v19 = vld [vmem:[#allocation10] sm:$0xff]  }
  0xd7   : > { %1789 = vmatprep.subr.bf16.mxu1 %v2102_v31 }
  0xd9   : > { %645 = vmatpush1.bf16.msra.mxu0 %v2080_v21  ;;  %v2118_v21 = vld [vmem:[#allocation10 + $0x10] sm:$0xff]  }
  0xda   : > { %646 = vmatprep.subr.bf16.mxu0 %v2081_v24  ;;  %1790 = vmatpush3.bf16.msra.mxu1 %v2103_v35  ;;  %v2121_v24 = vld [vmem:[#allocation10 + $0x28] sm:$0xff]  }
  0xdb   : > { %1791 = vmatprep.subr.bf16.mxu1 %v2104_v36 }
  0xdd   : > { %647 = vmatpush1.bf16.msra.mxu0 %v2083_v28 }
  0xde   : > { %1704 = vmatprep.subr.msk.bf16.mxu0 %vm625_vm1, %v1703_v30  ;;  %1792 = vmatpush3.bf16.msra.mxu1 %v2105_v37 }
  0xdf   : > { %1793 = vmatprep.subr.bf16.mxu1 %v2106_v38 }
  0xe1   : > { %649 = vmatpush1.bf16.msra.mxu0 %v627_v25 }
  0xe2   : > { %1794 = vmatpush3.bf16.msra.mxu1 %v2107_v39  ;;  %1877 = vmatprep.subr.bf16.mxu0 %v2116_v19 }
  0xe3   : > { %1857 = vmatprep.subr.bf16.mxu1 %v2108_v40 }
  0xe4   : > { %665 = vmatmul.mubr.bf16.vlgmr.msra.gmra.mrb[0].mxu0 %v2086_v32 }
  0xe5   : > { %1706 = vmatprep.mubr.msk.bf16.mxu0 %vm618_vm0, %v2089_v33  ;;  %1878 = vmatpush3.bf16.msra.mxu0 %v2116_v19 }
  0xe6   : > { %1879 = vmatprep.subr.bf16.mxu0 %v2117_v20 }
  0xe9   : > { %1880 = vmatpush3.bf16.msra.mxu0 %v2117_v20 }
  0xea   : > { %1881 = vmatprep.subr.bf16.mxu0 %v2118_v21 }
  0xec   : > { %675 = vmatmul.mubr.bf16.gmra.mrb[4].mxu0 %v2091_v34 }
  0xed   : > { %1882 = vmatpush3.bf16.msra.mxu0 %v2118_v21 }
  0xee   : > { %1883 = vmatprep.subr.bf16.mxu0 %v2119_v22 }
  0xf1   : > { %1884 = vmatpush3.bf16.msra.mxu0 %v2119_v22 }
  0xf2   : > { %1885 = vmatprep.subr.bf16.mxu0 %v2120_v23 }
  0xf5   : > { %1886 = vmatpush3.bf16.msra.mxu0 %v2120_v23 }
  0xf6   : > { %1887 = vmatprep.subr.bf16.mxu0 %v2121_v24 }
  0xf9   : > { %1888 = vmatpush3.bf16.msra.mxu0 %v2121_v24 }
 0x1b7   : > { %v666_v48 = vpop.f32.mrb[0].mxu0 }
 0x1b8   : > { %v667_v49 = vadd.f32 %v666_v48, %v508_v46  ;;  %v668_v50 = vpop.f32.mrb[1].mxu0  ;;  %v2122_v48 = vld [vmem:[#allocation10 + $0x30] sm:$0xff]  }
 0x1b9   : > { %v669_v51 = vadd.f32 %v668_v50, %v512_v47  ;;  %v670_v52 = vpop.f32.mrb[2].mxu0  ;;  %1889 = vmatprep.subr.bf16.mxu0 %v2122_v48  ;;  %v2124_v50 = vld [vmem:[#allocation8 + $0x40] sm:$0xff]  }
 0x1ba   : > { %v671_v53 = vadd.f32 %v670_v52, %v508_v46  ;;  %v672_v54 = vpop.f32.mrb[3].mxu0  ;;  %v685_v56 = vmax.f32 %v667_v49, 0.0  ;;  %1890 = vmatpush3.bf16.msra.mxu0 %v2122_v48  ;;  %v2123_v49 = vld [vmem:[#allocation10 + $0x38] sm:$0xff]   ;;  %v2126_v52 = vld [vmem:[#allocation8 + $0x50] sm:$0xff]  }
 0x1bb   : > { %v673_v55 = vadd.f32 %v672_v54, %v512_v47  ;;  %v686_v58 = vmax.f32 %v669_v51, 0.0  ;;  %1891 = vmatprep.subr.bf16.mxu0 %v2123_v49  ;;  %v2125_v51 = vld [vmem:[#allocation8 + $0x48] sm:$0xff]   ;;  %v2128_v54 = vld [vmem:[#allocation8 + $0x60] sm:$0xff]  }
 0x1bc   : > { %v687_v57 = vmax.f32 %v671_v53, 0.0  ;;  %v2127_v53 = vld [vmem:[#allocation8 + $0x58] sm:$0xff]  }
 0x1bd   : > { %v688_v59 = vmax.f32 %v673_v55, 0.0  ;;  %v1724_v55 = vld [vmem:[%s2879_s6] ss:$0 sm:$0xff] }
 0x1be   : > { %v693_v60 = vpack.c.bf16 %v687_v57, %v685_v56  ;;  %1892 = vmatpush3.bf16.msra.mxu0 %v2123_v49 }
 0x1bf   : > { %v676_v61 = vpop.f32.mrb[4].mxu0  ;;  %v694_v62 = vpack.c.bf16 %v688_v59, %v686_v58 }
 0x1c0   : > { %v677_v63 = vadd.f32 %v676_v61, %v508_v46  ;;  %v678_v0 = vpop.f32.mrb[5].mxu0 }
 0x1c1   : > { %v679_v2 = vadd.f32 %v678_v0, %v512_v47  ;;  %v680_v3 = vpop.f32.mrb[6].mxu0  ;;  %864 = vmatprep.mubr.bf16.mxu1 %v694_v62 }
 0x1c2   : > { %v681_v4 = vadd.f32 %v680_v3, %v508_v46  ;;  %v682_v5 = vpop.f32.mrb[7].mxu0  ;;  %865 = vmatmul.mubr.bf16.vlgmr.msra.gmra.mrb[0].mxu1 %v693_v60  ;;  %v689_v7 = vmax.f32 %v677_v63, 0.0 }
 0x1c3   : > { %v683_v6 = vadd.f32 %v682_v5, %v512_v47  ;;  %1858 = vmatpush3.bf16.msra.mxu1 %v2108_v40  ;;  %v690_v10 = vmax.f32 %v679_v2, 0.0 }
 0x1c4   : > { %v691_v8 = vmax.f32 %v681_v4, 0.0  ;;  %1859 = vmatprep.subr.bf16.mxu1 %v2109_v1 }
 0x1c5   : > { %v692_v11 = vmax.f32 %v683_v6, 0.0  ;;  %v2129_v6 = vld [vmem:[#allocation8 + $0x68] sm:$0xff]  }
 0x1c6   : > { %v695_v12 = vpack.c.bf16 %v691_v8, %v689_v7  ;;  %v2130_v7 = vld [vmem:[#allocation8 + $0x70] sm:$0xff]   ;;  %v2131_v8 = vld [vmem:[#allocation8 + $0x78] sm:$0xff]  }
 0x1c7   : > { %v696_v13 = vpack.c.bf16 %v692_v11, %v690_v10  ;;  %1860 = vmatpush3.bf16.msra.mxu1 %v2109_v1  ;;  %v2133_v10 = vld [vmem:[#allocation10 + $0x48] sm:$0xff]   ;;  %v2134_v11 = vld [vmem:[#allocation10 + $0x50] sm:$0xff]  }
 0x1c8   : > { %1861 = vmatprep.subr.bf16.mxu1 %v2110_v9 }
 0x1c9   : > { %872 = vmatprep.mubr.bf16.mxu1 %v696_v13  ;;  %v2136_v13 = vld [vmem:[#allocation10 + $0x60] sm:$0xff]  }
 0x1ca   : > { %873 = vmatmul.mubr.bf16.gmra.mrb[4].mxu1 %v695_v12  ;;  %v2135_v12 = vld [vmem:[#allocation10 + $0x58] sm:$0xff]  }
 0x1cb   : > { %1862 = vmatpush3.bf16.msra.mxu1 %v2110_v9  ;;  %v2132_v9 = vld [vmem:[#allocation10 + $0x40] sm:$0xff]  }
 0x1cc   : > { %1863 = vmatprep.subr.bf16.mxu1 %v2111_v14  ;;  %1917 = vmatprep.subr.bf16.mxu0 %v2132_v9 }
 0x1cf   : > { %1864 = vmatpush3.bf16.msra.mxu1 %v2111_v14  ;;  %v2137_v14 = vld [vmem:[#allocation10 + $0x68] sm:$0xff]  }
 0x1d0   : > { %1865 = vmatprep.subr.bf16.mxu1 %v2112_v15 }
 0x1d3   : > { %1866 = vmatpush3.bf16.msra.mxu1 %v2112_v15  ;;  %v1733_v15 = vld [vmem:[%s2914_s1] ss:$0 sm:$0xff] }
 0x1d4   : > { %1867 = vmatprep.subr.bf16.mxu1 %v2113_v16 }
 0x1d7   : > { %1868 = vmatpush3.bf16.msra.mxu1 %v2113_v16 }
 0x1d8   : > { %1869 = vmatprep.subr.bf16.mxu1 %v2114_v17 }
 0x1db   : > { %1870 = vmatpush3.bf16.msra.mxu1 %v2114_v17 }
 0x1dc   : > { %1871 = vmatprep.subr.bf16.mxu1 %v2115_v18 }
 0x1df   : > { %1872 = vmatpush3.bf16.msra.mxu1 %v2115_v18 }
 0x1e0   : > { %1897 = vmatprep.subr.bf16.mxu1 %v2124_v50 }
 0x295   : > { %v1795_v25 = vpop.f32.mrb[0].mxu1 }
 0x296   : > { %v1796_v27 = vpop.f32.mrb[1].mxu1 }
 0x297   : > { %v1797_v28 = vadd.f32 %v1796_v27, %v1795_v25  ;;  %v1798_v29 = vpop.f32.mrb[2].mxu1 }
 0x298   : > { %v1799_v30 = vpop.f32.mrb[3].mxu1 }
 0x299   : > { %v2754_v31 = vadd.f32 %v1797_v28, %v1707_v26  ;;  %v1800_v32 = vadd.f32 %v1799_v30, %v1798_v29 }
 0x29b   : > { %v2756_v33 = vadd.f32 %v1800_v32, %v1707_v26  ;;  %v881_v34 = vmax.f32 %v2754_v31, 0.0 }
 0x29d   : > { %v882_v35 = vmax.f32 %v2756_v33, 0.0  ;;  %v1801_v36 = vpop.f32.mrb[4].mxu1  ;;  %v2138_v33 = vld [vmem:[#allocation10 + $0x70] sm:$0xff]  }
 0x29e   : > { %v1802_v37 = vpop.f32.mrb[5].mxu1 }
 0x29f   : > { %v1803_v38 = vadd.f32 %v1802_v37, %v1801_v36  ;;  %v1804_v39 = vpop.f32.mrb[6].mxu1  ;;  %v919_v40 = vpack.c.bf16 %v882_v35, %v881_v34  ;;  %v2140_v36 = vld [vmem:[#allocation11] sm:$0xff]   ;;  %v2141_v37 = vld [vmem:[#allocation11 + $0x8] sm:$0xff]  }
 0x2a0   : > { %v1805_v41 = vpop.f32.mrb[7].mxu1 }
 0x2a1   : > { %v2764_v42 = vadd.f32 %v1803_v38, %v1707_v26  ;;  %v1806_v43 = vadd.f32 %v1805_v41, %v1804_v39  ;;  %1873 = vmatprep.mubr.bf16.mxu1 %v919_v40  ;;  %v2142_v38 = vld [vmem:[#allocation11 + $0x10] sm:$0xff]   ;;  %v2143_v39 = vld [vmem:[#allocation11 + $0x18] sm:$0xff]   ;;  %v2144_v40 = vld [vmem:[#allocation11 + $0x20] sm:$0xff]  }
 0x2a2   : > { %v1744_v41 = vld [vmem:[%s2879_s6 + $0x1] ss:$0 sm:$0xff] }
 0x2a3   : > { %v2766_v44 = vadd.f32 %v1806_v43, %v1707_v26  ;;  %v883_v45 = vmax.f32 %v2764_v42, 0.0 }
 0x2a5   : > { %v884_v46 = vmax.f32 %v2766_v44, 0.0 }
 0x2a7   : > { %v920_v47 = vpack.c.bf16 %v884_v46, %v883_v45 }
 0x2a9   : > { %1874 = vmatmul.mubr.bf16.vlgmr.msra.gmra.mrb[8].mxu1 %v920_v47 }
 0x2aa   : > { %1898 = vmatpush3.bf16.msra.mxu1 %v2124_v50 }
 0x2ab   : > { %1899 = vmatprep.subr.bf16.mxu1 %v2125_v51 }
 0x2ae   : > { %1900 = vmatpush3.bf16.msra.mxu1 %v2125_v51 }
 0x2af   : > { %1901 = vmatprep.subr.bf16.mxu1 %v2126_v52 }
 0x2b2   : > { %1902 = vmatpush3.bf16.msra.mxu1 %v2126_v52 }
 0x2b3   : > { %1903 = vmatprep.subr.bf16.mxu1 %v2127_v53 }
 0x2b6   : > { %1904 = vmatpush3.bf16.msra.mxu1 %v2127_v53 }
 0x2b7   : > { %1905 = vmatprep.subr.bf16.mxu1 %v2128_v54 }
 0x2ba   : > { %1906 = vmatpush3.bf16.msra.mxu1 %v2128_v54 }
 0x2bb   : > { %1907 = vmatprep.subr.bf16.mxu1 %v2129_v6 }
 0x2be   : > { %1908 = vmatpush3.bf16.msra.mxu1 %v2129_v6 }
 0x2bf   : > { %1909 = vmatprep.subr.bf16.mxu1 %v2130_v7 }
 0x2c2   : > { %1910 = vmatpush3.bf16.msra.mxu1 %v2130_v7 }
 0x2c3   : > { %1911 = vmatprep.subr.bf16.mxu1 %v2131_v8 }
 0x2c6   : > { %1912 = vmatpush3.bf16.msra.mxu1 %v2131_v8 }
 0x2c7   : > { %1937 = vmatprep.subr.bf16.mxu1 %v2140_v36 }
 0x37c   : > { %v1875_v56 = vpop.f32.mrb[8].mxu1 }
 0x37d   : > { %v1018_v57 = vadd.f32 %v1875_v56, %v1724_v55  ;;  %v1009_v58 = vpop.f32.mrb[9].mxu1  ;;  %v2145_v56 = vld [vmem:[#allocation11 + $0x28] sm:$0xff]  }
 0x37e   : > { %v1010_v59 = vadd.f32 %v1724_v55, %v1009_v58  ;;  %v1876_v60 = vpop.f32.mrb[10].mxu1  ;;  %v2147_v58 = vld [vmem:[#allocation11 + $0x38] sm:$0xff]  }
 0x37f   : > { %v1021_v61 = vadd.f32 %v1876_v60, %v1724_v55  ;;  %v1012_v62 = vpop.f32.mrb[11].mxu1  ;;  %v1026_v0 = vmax.f32 %v1018_v57, 0.0  ;;  %v2146_v57 = vld [vmem:[#allocation11 + $0x30] sm:$0xff]  }
 0x380   : > { %v1013_v63 = vadd.f32 %v1724_v55, %v1012_v62  ;;  %v1024_v2 = vmax.f32 %v1010_v59, 0.0  ;;  %v1753_v59 = vld [vmem:[%s2914_s1 + $0x1] ss:$0 sm:$0xff] }
 0x381   : > { %v1027_v1 = vmax.f32 %v1021_v61, 0.0 }
 0x382   : > { %v1025_v3 = vmax.f32 %v1013_v63, 0.0 }
 0x383   : > { %v1029_v4 = vpack.c.bf16 %v1027_v1, %v1026_v0 }
 0x384   : > { %v1028_v5 = vpack.c.bf16 %v1025_v3, %v1024_v2 }
 0x386   : > { %1893 = vmatprep.mubr.bf16.mxu0 %v1028_v5 }
 0x387   : > { %1894 = vmatmul.mubr.bf16.vlgmr.msra.gmra.mrb[8].mxu0 %v1029_v4 }
 0x388   : > { %1918 = vmatpush3.bf16.msra.mxu0 %v2132_v9 }
 0x389   : > { %1919 = vmatprep.subr.bf16.mxu0 %v2133_v10 }
 0x38c   : > { %1920 = vmatpush3.bf16.msra.mxu0 %v2133_v10 }
 0x38d   : > { %1921 = vmatprep.subr.bf16.mxu0 %v2134_v11 }
 0x390   : > { %1922 = vmatpush3.bf16.msra.mxu0 %v2134_v11 }
 0x391   : > { %1923 = vmatprep.subr.bf16.mxu0 %v2135_v12 }
 0x394   : > { %1924 = vmatpush3.bf16.msra.mxu0 %v2135_v12 }
 0x395   : > { %1925 = vmatprep.subr.bf16.mxu0 %v2136_v13 }
 0x398   : > { %1926 = vmatpush3.bf16.msra.mxu0 %v2136_v13 }
 0x399   : > { %1927 = vmatprep.subr.bf16.mxu0 %v2137_v14 }
 0x39c   : > { %1928 = vmatpush3.bf16.msra.mxu0 %v2137_v14  ;;  %v1762_v14 = vld [vmem:[%s2915_s14] ss:$0 sm:$0xff] }
 0x39d   : > { %1929 = vmatprep.subr.bf16.mxu0 %v2138_v33 }
 0x3a0   : > { %1930 = vmatpush3.bf16.msra.mxu0 %v2138_v33 }
 0x45a   : > { %v1895_v16 = vpop.f32.mrb[8].mxu0 }
 0x45b   : > { %v1127_v17 = vadd.f32 %v1895_v16, %v1733_v15  ;;  %v1118_v18 = vpop.f32.mrb[9].mxu0 }
 0x45c   : > { %v1119_v19 = vadd.f32 %v1733_v15, %v1118_v18  ;;  %v1896_v20 = vpop.f32.mrb[10].mxu0 }
 0x45d   : > { %v1130_v21 = vadd.f32 %v1896_v20, %v1733_v15  ;;  %v1121_v22 = vpop.f32.mrb[11].mxu0  ;;  %v2786_v25 = vadd.f32 %v1127_v17, %v883_v45 }
 0x45e   : > { %v2782_v23 = vadd.f32 %v1119_v19, %v881_v34  ;;  %v1122_v24 = vadd.f32 %v1733_v15, %v1121_v22 }
 0x45f   : > { %v2790_v26 = vadd.f32 %v1130_v21, %v884_v46  ;;  %v1139_v31 = vmax.f32 %v2786_v25, 0.0 }
 0x460   : > { %v2794_v27 = vadd.f32 %v1122_v24, %v882_v35  ;;  %v1137_v29 = vmax.f32 %v2782_v23, 0.0  ;;  %v2139_v35 = vld [vmem:[#allocation10 + $0x78] sm:$0xff]  }
 0x461   : > { %v1140_v28 = vmax.f32 %v2790_v26, 0.0  ;;  %1931 = vmatprep.subr.bf16.mxu0 %v2139_v35 }
 0x462   : > { %v1138_v30 = vmax.f32 %v2794_v27, 0.0  ;;  %1932 = vmatpush3.bf16.msra.mxu0 %v2139_v35 }
 0x463   : > { %v1180_v34 = vpack.c.bf16 %v1140_v28, %v1139_v31 }
 0x464   : > { %v1179_v32 = vpack.c.bf16 %v1138_v30, %v1137_v29 }
 0x466   : > { %1913 = vmatprep.mubr.bf16.mxu1 %v1179_v32 }
 0x467   : > { %1914 = vmatmul.mubr.bf16.vlgmr.msra.gmra.mrb[12].mxu1 %v1180_v34 }
 0x468   : > { %1938 = vmatpush3.bf16.msra.mxu1 %v2140_v36 }
 0x469   : > { %1939 = vmatprep.subr.bf16.mxu1 %v2141_v37 }
 0x46c   : > { %1940 = vmatpush3.bf16.msra.mxu1 %v2141_v37 }
 0x46d   : > { %1941 = vmatprep.subr.bf16.mxu1 %v2142_v38 }
 0x470   : > { %1942 = vmatpush3.bf16.msra.mxu1 %v2142_v38 }
 0x471   : > { %1943 = vmatprep.subr.bf16.mxu1 %v2143_v39 }
 0x474   : > { %1944 = vmatpush3.bf16.msra.mxu1 %v2143_v39 }
 0x475   : > { %1945 = vmatprep.subr.bf16.mxu1 %v2144_v40 }
 0x478   : > { %1946 = vmatpush3.bf16.msra.mxu1 %v2144_v40 }
 0x479   : > { %1947 = vmatprep.subr.bf16.mxu1 %v2145_v56 }
 0x47c   : > { %1948 = vmatpush3.bf16.msra.mxu1 %v2145_v56 }
 0x47d   : > { %1949 = vmatprep.subr.bf16.mxu1 %v2146_v57 }
 0x480   : > { %1950 = vmatpush3.bf16.msra.mxu1 %v2146_v57 }
 0x481   : > { %1951 = vmatprep.subr.bf16.mxu1 %v2147_v58 }
 0x484   : > { %1952 = vmatpush3.bf16.msra.mxu1 %v2147_v58 }
 0x53a   : > { %v1915_v42 = vpop.f32.mrb[12].mxu1 }
 0x53b   : > { %v1278_v43 = vadd.f32 %v1915_v42, %v1744_v41  ;;  %v1269_v44 = vpop.f32.mrb[13].mxu1 }
 0x53c   : > { %v1270_v45 = vadd.f32 %v1744_v41, %v1269_v44  ;;  %v1916_v46 = vpop.f32.mrb[14].mxu1 }
 0x53d   : > { %v1281_v47 = vadd.f32 %v1916_v46, %v1744_v41  ;;  %v1272_v48 = vpop.f32.mrb[15].mxu1  ;;  %v1286_v50 = vmax.f32 %v1278_v43, 0.0 }
 0x53e   : > { %v1273_v49 = vadd.f32 %v1744_v41, %v1272_v48  ;;  %v1284_v52 = vmax.f32 %v1270_v45, 0.0 }
 0x53f   : > { %v1287_v51 = vmax.f32 %v1281_v47, 0.0 }
 0x540   : > { %v1285_v53 = vmax.f32 %v1273_v49, 0.0 }
 0x541   : > { %v1289_v54 = vpack.c.bf16 %v1287_v51, %v1286_v50 }
 0x542   : > { %v1288_v55 = vpack.c.bf16 %v1285_v53, %v1284_v52 }
 0x544   : > { %1933 = vmatprep.mubr.bf16.mxu0 %v1288_v55 }
 0x545   : > { %1934 = vmatmul.mubr.bf16.vlgmr.msra.gmra.mrb[12].mxu0 %v1289_v54 }
 0x618   : > { %v1935_v60 = vpop.f32.mrb[12].mxu0 }
 0x619   : > { %v1387_v61 = vadd.f32 %v1935_v60, %v1753_v59  ;;  %v1378_v62 = vpop.f32.mrb[13].mxu0 }
 0x61a   : > { %v1379_v63 = vadd.f32 %v1753_v59, %v1378_v62  ;;  %v1936_v0 = vpop.f32.mrb[14].mxu0 }
 0x61b   : > { %v1395_v1 = vadd.f32 %v1387_v61, %v1139_v31  ;;  %v1390_v2 = vadd.f32 %v1936_v0, %v1753_v59  ;;  %v1381_v3 = vpop.f32.mrb[15].mxu0 }
 0x61c   : > { %v1393_v4 = vadd.f32 %v1379_v63, %v1137_v29  ;;  %v1382_v5 = vadd.f32 %v1753_v59, %v1381_v3 }
 0x61d   : > { %v1396_v6 = vadd.f32 %v1390_v2, %v1140_v28  ;;  %v1399_v8 = vmax.f32 %v1395_v1, 0.0 }
 0x61e   : > { %v1394_v7 = vadd.f32 %v1382_v5, %v1138_v30  ;;  %v1397_v10 = vmax.f32 %v1393_v4, 0.0 }
 0x61f   : > { %v1400_v9 = vmax.f32 %v1396_v6, 0.0 }
 0x620   : > { %v1398_v11 = vmax.f32 %v1394_v7, 0.0 }
 0x621   : > { %v1402_v12 = vpack.c.bf16 %v1400_v9, %v1399_v8 }
 0x622   : > { %v1401_v13 = vpack.c.bf16 %v1398_v11, %v1397_v10 }
 0x624   : > { %1953 = vmatprep.mubr.bf16.mxu1 %v1401_v13 }
 0x625   : > { %1954 = vmatmul.mubr.bf16.vlgmr.msra.gmra.mrb[16].mxu1 %v1402_v12 }
 0x6f8   : > { %v1955_v15 = vpop.f32.mrb[16].mxu1 }
 0x6f9   : > { %v1517_v16 = vadd.f32 %v1955_v15, %v1762_v14  ;;  %v1508_v17 = vpop.f32.mrb[17].mxu1 }
 0x6fa   : > { %v1509_v18 = vadd.f32 %v1762_v14, %v1508_v17  ;;  %v1956_v19 = vpop.f32.mrb[18].mxu1 }
 0x6fb   : > { %1525 = vst [vmem:[%s478_s25 + $0x10] sm:$0xff] %v1517_v16  ;;  %v1520_v20 = vadd.f32 %v1956_v19, %v1762_v14  ;;  %v1511_v21 = vpop.f32.mrb[19].mxu1 }
 0x6fc   : > { %1523 = vst [vmem:[%s478_s25] sm:$0xff] %v1509_v18  ;;  %v1512_v22 = vadd.f32 %v1762_v14, %v1511_v21 }
 0x6fd   : > { %1526 = vst [vmem:[%s478_s25 + $0x18] sm:$0xff] %v1520_v20 }
 0x6fe   : > { %1524 = vst [vmem:[%s478_s25 + $0x8] sm:$0xff] %v1512_v22 }
 0x6ff   : > { %2331 = shalt.err (!%p2328_p8)
}
 0x700   : > { %s2332_s14 = scalar_lea.hbm %s2829_s8, 512  ;;  %s2336_s15 = scalar_lea.hbm %s2916_s22, 1024 }
 0x701   : > { %p2333_p6 = scmp.ne.s32.totalorder %s2829_s8, %s2332_s14  ;;  %p2337_p3 = scmp.lt.u32.totalorder %s2829_s8, %s2916_s22 }
 0x702   : > { %p2338_p0 = scmp.lt.u32.totalorder %s2336_s15, %s2332_s14  ;;  %p2340_p2 = scmp.lt.u32.totalorder %s2332_s14, %s2829_s8 }
 0x703   : > { %p2334_p9 = pnand %p2333_p6, %p2917_p7 }
 0x704   : > { %p2339_p5 = por %p2338_p0, %p2337_p3 }
 0x705   : > { %p2335_p4 = pneg %p2334_p9 }
 0x706   : > { %p2341_p10 = por %p2340_p2, %p2339_p5 }
 0x708   : > { %p2342_p1 = pnand %p2341_p10, %p2335_p4 }
 0x70a   : > { %2345 = shalt.err (!%p2342_p1)
}
 0x70b   : > { %s2409_s29 = smov 128   ;;  %s2410_s13 = smov 8  }
 0x70c   : > { %1979 = dma.vmem_to_hbm [thread:$0]  (%p2917_p7), %s2824_s27, 512, %s2829_s8, %s1528_s23, %s2409_s29, %s2409_s29, %s2410_s13  }
 0x70d PF: > { %s1556_s10 = sand.u32 1, %s2384_s17   ;;  %p2918_p11 = scmp.ne.s32.totalorder %s2903_s21, 0 }
 0x70e   : > { %p2919_p12 = scmp.ge.s32.totalorder %s2396_s20, 2  ;;  %s1557_s14 = scalar_lea.sflag [#allocation4], %s1556_s10 }
 0x710   : > { %p2002_p13 = pnand %p2919_p12, %p2918_p11 }
 0x712   : > { %2379 = dma.done.wait (!%p2002_p13), %s1557_s14, 512  }
 0x713   : > { %2381 = vsyncadd (!%p2002_p13), %s1557_s14, 4294966784  ;;  %p27_p8 = scmp.ge.s32.totalorder %s2640_s16, 4   ;;  %s2920_s17 = smov %s2388_s18 }
 0x714   : > { %s2921_s18 = smov %s2392_s19  ;;  %s2922_s19 = smov %s2652_s30 }
 0x715   : > { %s2923_s20 = smov %s2640_s16  ;;  %29 = sbr.rel (!%p27_p8) target bundleno = 13 (0xd), region = 133 }
 0x71c   :  { %1562 = vsyncpa [#allocation3], 1 }
 0x71d   :  { %1564 = vsyncpa [#allocation3 + $0x1], 1 }
 0x71e   :  { %1565 = vsyncpa [#allocation6], 1 }
 0x71f   :  { %1566 = vsyncpa [#allocation9], 1 }
 0x720   :  { %1567 = vsyncpa [#allocation12], 1 }
 0x721   :  { %1568 = vsyncpa [#allocation4], 1 }
 0x722   :  { %1570 = vsyncpa [#allocation4 + $0x1], 1 }

</bundles_post_ra>
